<compile_context>
chip_gen: v6e
topology: v6e:2x2x1
jax: 0.10.0
libtpu: 0.0.40
codegen_flags: <defaults>
</compile_context>

<pallas_src>
from functools import partial

import jax
import jax.numpy as jnp
from jax.experimental import pallas as pl
from jax.experimental.pallas import tpu as pltpu


def mha_kernel(x_ref, wq_ref, wk_ref, wv_ref, bq_ref, bk_ref, bv_ref,
               wo_ref, bo_ref, o_ref, *, num_heads, head_dim, compute_dtype):
    """One batch element per grid step: QKV proj -> batched-head SDPA -> out proj."""
    H, D = num_heads, head_dim
    S = x_ref.shape[1]
    E = H * D

    x = x_ref[0].astype(compute_dtype)                                   # (S, E)

    # Three separate (S,E)@(E,E) projections (smaller live intermediates than a
    # single (S,3E) slab).  Bias adds happen on the f32 accumulator.
    # The 1/sqrt(D) attention scale is already folded into wq/bq (prepare_params).
    q = jnp.dot(x, wq_ref[...], preferred_element_type=jnp.float32) + bq_ref[...]
    k = jnp.dot(x, wk_ref[...], preferred_element_type=jnp.float32) + bk_ref[...]
    v = jnp.dot(x, wv_ref[...], preferred_element_type=jnp.float32) + bv_ref[...]

    q3 = q.reshape(S, H, D).astype(compute_dtype)
    k3 = k.reshape(S, H, D).astype(compute_dtype)
    v3 = v.reshape(S, H, D).astype(compute_dtype)

    # Scores for all heads in one batched contraction over D (no explicit k.T).
    s = jnp.einsum('qhd,khd->hqk', q3, k3,
                   preferred_element_type=jnp.float32)                    # (H, S, S)

    # Numerically-stable softmax; normalization deferred past the PV matmul so
    # the divide only touches (S, H, D) instead of the (H, S, S) score tensor.
    m = jnp.max(s, axis=-1, keepdims=True)                                # (H, S, 1)
    p = jnp.exp(s - m)                                                    # (H, S, S)
    l = jnp.sum(p, axis=-1)                                               # (H, S)
    inv_l = pl.reciprocal(l, approx=True).T                               # (S, H)

    # Unnormalized PV product, emitted in (q, h, d) order so merging heads back
    # into a lane-dense (S, E) slab is a plain reshape.
    o_heads = jnp.einsum('hqk,khd->qhd', p.astype(compute_dtype), v3,
                         preferred_element_type=jnp.float32)              # (S, H, D)
    attn = (o_heads * inv_l[:, :, None]).reshape(S, E).astype(compute_dtype)

    out = jnp.dot(attn, wo_ref[...],
                  preferred_element_type=jnp.float32) + bo_ref[...]       # (S, E) f32
    o_ref[0] = out.astype(o_ref.dtype)


def prepare_params(wqkv, bqkv, wproj, bproj, num_heads,
                   compute_dtype=jnp.bfloat16):
    """One-time conversion of PyTorch-layout params into kernel layout.

    Splits the fused in_proj into per-Q/K/V (E, E) matrices, transposes
    (out,in)->(in,out), folds the 1/sqrt(head_dim) attention scale into the Q
    projection, and casts weights to the MXU compute dtype (biases stay f32:
    they are added after f32 accumulation).  Call once and cache the result.
    """
    E = wproj.shape[0]
    D = E // num_heads
    scale = 1.0 / float(D) ** 0.5
    wq, wk, wv = jnp.split(wqkv, 3, axis=0)            # each (E, E), torch (out, in)
    bq, bk, bv = jnp.split(bqkv, 3, axis=0)
    return (
        (wq.T * scale).astype(compute_dtype),
        wk.T.astype(compute_dtype),
        wv.T.astype(compute_dtype),
        (bq * scale).reshape(1, E).astype(jnp.float32),
        bk.reshape(1, E).astype(jnp.float32),
        bv.reshape(1, E).astype(jnp.float32),
        wproj.T.astype(compute_dtype),
        bproj.reshape(1, E).astype(jnp.float32),
    )


def plain_mha_pallas(x, params, num_heads, compute_dtype=jnp.bfloat16):
    """x: (B, S, E); params: output of prepare_params (cached outside hot path)."""
    B, S, E = x.shape
    D = E // num_heads
    wq, wk, wv, bq, bk, bv, wo, bo = params

    kernel = partial(mha_kernel, num_heads=num_heads, head_dim=D,
                     compute_dtype=compute_dtype)

    w_spec = pl.BlockSpec((E, E), lambda b: (0, 0))
    b_spec = pl.BlockSpec((1, E), lambda b: (0, 0))

    # TODO(synk): for long sequences (S >= ~1-2K) this whole-sequence block must
    # be replaced by a flash-style S-tiled grid (online softmax, running m/l),
    # sized for the per-generation VMEM budget (v7x 64 MiB vs v5e/v6e 128 MiB).
    return pl.pallas_call(
        kernel,
        out_shape=jax.ShapeDtypeStruct((B, S, E), x.dtype),
        grid_spec=pltpu.PrefetchScalarGridSpec(
            num_scalar_prefetch=0,
            grid=(B,),
            in_specs=[
                pl.BlockSpec((1, S, E), lambda b: (b, 0, 0)),   # x, one batch row
                w_spec, w_spec, w_spec,                          # wq, wk, wv
                b_spec, b_spec, b_spec,                          # bq, bk, bv
                w_spec,                                          # wo
                b_spec,                                          # bo
            ],
            out_specs=pl.BlockSpec((1, S, E), lambda b: (b, 0, 0)),
        ),
        compiler_params=pltpu.CompilerParams(
            dimension_semantics=("parallel",)),
    )(x, wq, wk, wv, bq, bk, bv, wo, bo)


def plain_mha_reference(x, wqkv, bqkv, wproj, bproj, num_heads):
    """Pure-JAX f32 reference matching PyTorch PlainMultiHeadAttention.forward."""
    B, S, E = x.shape
    D = E // num_heads
    qkv = x @ wqkv.T + bqkv
    q, k, v = jnp.split(qkv, 3, axis=-1)

    def split_heads(t):
        return t.reshape(B, S, num_heads, D).transpose(0, 2, 1, 3)      # (B, H, S, D)

    q, k, v = map(split_heads, (q, k, v))
    s = jnp.einsum('bhqd,bhkd->bhqk', q, k) / jnp.sqrt(jnp.float32(D))
    a = jax.nn.softmax(s, axis=-1)
    o = jnp.einsum('bhqk,bhkd->bhqd', a, v)
    o = o.transpose(0, 2, 1, 3).reshape(B, S, E)
    return o @ wproj.T + bproj


if __name__ == "__main__":
    # Small shapes consistent with the module: embed_dim=32, num_heads=4 (head_dim=8)
    B, S, E, H = 2, 8, 32, 4

    key = jax.random.PRNGKey(0)
    kx, kw1, kb1, kw2, kb2 = jax.random.split(key, 5)

    # Deterministic synthetic parameters (PyTorch layouts).
    x = jax.random.normal(kx, (B, S, E), dtype=jnp.float32)             # query=key=value
    wqkv = jax.random.normal(kw1, (3 * E, E), dtype=jnp.float32) * 0.1  # in_proj_weight
    bqkv = jax.random.normal(kb1, (3 * E,), dtype=jnp.float32) * 0.1    # in_proj_bias
    wproj = jax.random.normal(kw2, (E, E), dtype=jnp.float32) * 0.1     # out_proj.weight
    bproj = jax.random.normal(kb2, (E,), dtype=jnp.float32) * 0.1       # out_proj.bias

    params = prepare_params(wqkv, bqkv, wproj, bproj, H)  # once, outside the hot path
    out = plain_mha_pallas(x, params, H)
    out = jax.block_until_ready(out)

    ref = plain_mha_reference(x, wqkv, bqkv, wproj, bproj, H)
    assert out.shape == (B, S, E)
    # bf16 MXU operands (f32 accumulation) + approx reciprocal => bf16-level tolerance.
    max_err = float(jnp.max(jnp.abs(out - ref)))
    assert jnp.allclose(out, ref, atol=2e-2, rtol=2e-2), (
        f"mismatch vs reference, max abs err = {max_err}")

    # TODO(synk): key_padding_mask / attn_mask / is_causal branches are not exercised
    # (the default-None eval path of the PyTorch forward is implemented).
    print("KERNEL_OK")
</pallas_src>

<mosaic_0001>
module attributes {stable_mosaic.version = 11 : i64} {
  func.func @mha_kernel(%arg0: i32, %arg1: memref<1x8x32xf32, #tpu.memory_space<vmem>>, %arg2: memref<32x32xbf16, #tpu.memory_space<vmem>>, %arg3: memref<32x32xbf16, #tpu.memory_space<vmem>>, %arg4: memref<32x32xbf16, #tpu.memory_space<vmem>>, %arg5: memref<1x32xf32, #tpu.memory_space<vmem>>, %arg6: memref<1x32xf32, #tpu.memory_space<vmem>>, %arg7: memref<1x32xf32, #tpu.memory_space<vmem>>, %arg8: memref<32x32xbf16, #tpu.memory_space<vmem>>, %arg9: memref<1x32xf32, #tpu.memory_space<vmem>>, %arg10: memref<1x8x32xf32, #tpu.memory_space<vmem>>) attributes {dimension_semantics = [#tpu.dimension_semantics<parallel>], iteration_bounds = array<i64: 2>, scalar_prefetch = 0 : i64, scratch_operands = 0 : i64, tpu.core_type = #tpu.core_type<tc>, window_params = [{transform_indices = @transform_0, window_bounds = array<i64: 1, 8, 32>}, {pipeline_mode = #tpu.pipeline_mode<synchronous>, transform_indices = @transform_1, window_bounds = array<i64: 32, 32>}, {pipeline_mode = #tpu.pipeline_mode<synchronous>, transform_indices = @transform_2, window_bounds = array<i64: 32, 32>}, {pipeline_mode = #tpu.pipeline_mode<synchronous>, transform_indices = @transform_3, window_bounds = array<i64: 32, 32>}, {pipeline_mode = #tpu.pipeline_mode<synchronous>, transform_indices = @transform_4, window_bounds = array<i64: 1, 32>}, {pipeline_mode = #tpu.pipeline_mode<synchronous>, transform_indices = @transform_5, window_bounds = array<i64: 1, 32>}, {pipeline_mode = #tpu.pipeline_mode<synchronous>, transform_indices = @transform_6, window_bounds = array<i64: 1, 32>}, {pipeline_mode = #tpu.pipeline_mode<synchronous>, transform_indices = @transform_7, window_bounds = array<i64: 32, 32>}, {pipeline_mode = #tpu.pipeline_mode<synchronous>, transform_indices = @transform_8, window_bounds = array<i64: 1, 32>}, {transform_indices = @transform_9, window_bounds = array<i64: 1, 8, 32>}]} {
    %c0 = arith.constant 0 : index
    %c0_0 = arith.constant 0 : index
    %c0_1 = arith.constant 0 : index
    %0 = vector.load %arg1[%c0, %c0_0, %c0_1] : memref<1x8x32xf32, #tpu.memory_space<vmem>>, vector<1x8x32xf32>
    %1 = vector.shape_cast %0 : vector<1x8x32xf32> to vector<8x32xf32>
    %2 = arith.truncf %1 : vector<8x32xf32> to vector<8x32xbf16>
    %c0_2 = arith.constant 0 : index
    %c0_3 = arith.constant 0 : index
    %3 = vector.load %arg2[%c0_2, %c0_3] : memref<32x32xbf16, #tpu.memory_space<vmem>>, vector<32x32xbf16>
    %cst = arith.constant dense<0.000000e+00> : vector<8x32xf32>
    %4 = tpu.matmul %2, %3, %cst {dimension_numbers = #tpu.dot_dimension_numbers<[1], [0], [0], [1], [0, 0, 1, 1], [], []>} : vector<8x32xbf16>, vector<32x32xbf16>, vector<8x32xf32> -> vector<8x32xf32>
    %c0_4 = arith.constant 0 : index
    %c0_5 = arith.constant 0 : index
    %5 = vector.load %arg5[%c0_4, %c0_5] : memref<1x32xf32, #tpu.memory_space<vmem>>, vector<1x32xf32>
    %6 = vector.broadcast %5 : vector<1x32xf32> to vector<8x32xf32>
    %7 = arith.addf %4, %6 : vector<8x32xf32>
    %c0_6 = arith.constant 0 : index
    %c0_7 = arith.constant 0 : index
    %8 = vector.load %arg3[%c0_6, %c0_7] : memref<32x32xbf16, #tpu.memory_space<vmem>>, vector<32x32xbf16>
    %cst_8 = arith.constant dense<0.000000e+00> : vector<8x32xf32>
    %9 = tpu.matmul %2, %8, %cst_8 {dimension_numbers = #tpu.dot_dimension_numbers<[1], [0], [0], [1], [0, 0, 1, 1], [], []>} : vector<8x32xbf16>, vector<32x32xbf16>, vector<8x32xf32> -> vector<8x32xf32>
    %c0_9 = arith.constant 0 : index
    %c0_10 = arith.constant 0 : index
    %10 = vector.load %arg6[%c0_9, %c0_10] : memref<1x32xf32, #tpu.memory_space<vmem>>, vector<1x32xf32>
    %11 = vector.broadcast %10 : vector<1x32xf32> to vector<8x32xf32>
    %12 = arith.addf %9, %11 : vector<8x32xf32>
    %c0_11 = arith.constant 0 : index
    %c0_12 = arith.constant 0 : index
    %13 = vector.load %arg4[%c0_11, %c0_12] : memref<32x32xbf16, #tpu.memory_space<vmem>>, vector<32x32xbf16>
    %cst_13 = arith.constant dense<0.000000e+00> : vector<8x32xf32>
    %14 = tpu.matmul %2, %13, %cst_13 {dimension_numbers = #tpu.dot_dimension_numbers<[1], [0], [0], [1], [0, 0, 1, 1], [], []>} : vector<8x32xbf16>, vector<32x32xbf16>, vector<8x32xf32> -> vector<8x32xf32>
    %c0_14 = arith.constant 0 : index
    %c0_15 = arith.constant 0 : index
    %15 = vector.load %arg7[%c0_14, %c0_15] : memref<1x32xf32, #tpu.memory_space<vmem>>, vector<1x32xf32>
    %16 = vector.broadcast %15 : vector<1x32xf32> to vector<8x32xf32>
    %17 = arith.addf %14, %16 : vector<8x32xf32>
    %18 = vector.shape_cast %7 : vector<8x32xf32> to vector<8x4x8xf32>
    %19 = arith.truncf %18 : vector<8x4x8xf32> to vector<8x4x8xbf16>
    %20 = vector.shape_cast %12 : vector<8x32xf32> to vector<8x4x8xf32>
    %21 = arith.truncf %20 : vector<8x4x8xf32> to vector<8x4x8xbf16>
    %22 = vector.shape_cast %17 : vector<8x32xf32> to vector<8x4x8xf32>
    %23 = arith.truncf %22 : vector<8x4x8xf32> to vector<8x4x8xbf16>
    "tpu.trace_start"() <{level = 10 : i32, message = "qhd,khd->hqk"}> : () -> ()
    %cst_16 = arith.constant dense<0.000000e+00> : vector<4x8x8xf32>
    %24 = tpu.matmul %19, %21, %cst_16 {dimension_numbers = #tpu.dot_dimension_numbers<[2], [2], [0], [0], [0, 1, 0, 0, 1, 0], [1], [1]>} : vector<8x4x8xbf16>, vector<8x4x8xbf16>, vector<4x8x8xf32> -> vector<4x8x8xf32>
    "tpu.trace_stop"() : () -> ()
    %cst_17 = arith.constant dense<0xFF800000> : vector<4x8xf32>
    %25 = vector.multi_reduction <maximumf>, %24, %cst_17 [2] : vector<4x8x8xf32> to vector<4x8xf32>
    %26 = vector.shape_cast %25 : vector<4x8xf32> to vector<4x8x1xf32>
    %27 = vector.broadcast %26 : vector<4x8x1xf32> to vector<4x8x8xf32>
    %28 = arith.subf %24, %27 : vector<4x8x8xf32>
    %29 = math.exp %28 : vector<4x8x8xf32>
    %cst_18 = arith.constant dense<0.000000e+00> : vector<4x8xf32>
    %30 = vector.multi_reduction <add>, %29, %cst_18 [2] : vector<4x8x8xf32> to vector<4x8xf32>
    %31 = tpu.reciprocal %30 {approx = true} : vector<4x8xf32> -> vector<4x8xf32>
    %32 = tpu.transpose %31, [1, 0] : vector<4x8xf32> -> vector<8x4xf32>
    %33 = arith.truncf %29 : vector<4x8x8xf32> to vector<4x8x8xbf16>
    "tpu.trace_start"() <{level = 10 : i32, message = "hqk,khd->qhd"}> : () -> ()
    %cst_19 = arith.constant dense<0.000000e+00> : vector<4x8x8xf32>
    %34 = tpu.matmul %23, %33, %cst_19 {dimension_numbers = #tpu.dot_dimension_numbers<[0], [2], [2], [1], [0, 1, 0, 2, 1, 1], [1], [0]>} : vector<8x4x8xbf16>, vector<4x8x8xbf16>, vector<4x8x8xf32> -> vector<4x8x8xf32>
    %35 = tpu.transpose %34, [2, 0, 1] : vector<4x8x8xf32> -> vector<8x4x8xf32>
    "tpu.trace_stop"() : () -> ()
    %36 = vector.shape_cast %32 : vector<8x4xf32> to vector<8x4x1xf32>
    %37 = vector.broadcast %36 : vector<8x4x1xf32> to vector<8x4x8xf32>
    %38 = arith.mulf %35, %37 : vector<8x4x8xf32>
    %39 = vector.shape_cast %38 : vector<8x4x8xf32> to vector<8x32xf32>
    %40 = arith.truncf %39 : vector<8x32xf32> to vector<8x32xbf16>
    %c0_20 = arith.constant 0 : index
    %c0_21 = arith.constant 0 : index
    %41 = vector.load %arg8[%c0_20, %c0_21] : memref<32x32xbf16, #tpu.memory_space<vmem>>, vector<32x32xbf16>
    %cst_22 = arith.constant dense<0.000000e+00> : vector<8x32xf32>
    %42 = tpu.matmul %40, %41, %cst_22 {dimension_numbers = #tpu.dot_dimension_numbers<[1], [0], [0], [1], [0, 0, 1, 1], [], []>} : vector<8x32xbf16>, vector<32x32xbf16>, vector<8x32xf32> -> vector<8x32xf32>
    %c0_23 = arith.constant 0 : index
    %c0_24 = arith.constant 0 : index
    %43 = vector.load %arg9[%c0_23, %c0_24] : memref<1x32xf32, #tpu.memory_space<vmem>>, vector<1x32xf32>
    %44 = vector.broadcast %43 : vector<1x32xf32> to vector<8x32xf32>
    %45 = arith.addf %42, %44 : vector<8x32xf32>
    %c0_25 = arith.constant 0 : index
    %c0_26 = arith.constant 0 : index
    %c0_27 = arith.constant 0 : index
    %46 = vector.load %arg10[%c0_25, %c0_26, %c0_27] : memref<1x8x32xf32, #tpu.memory_space<vmem>>, vector<1x8x32xf32>
    %47 = vector.shape_cast %46 : vector<1x8x32xf32> to vector<8x32xf32>
    %48 = vector.shape_cast %45 : vector<8x32xf32> to vector<1x8x32xf32>
    tpu.vector_store %arg10[%c0_25, %c0_26, %c0_27], %48 {strides = array<i32>} : memref<1x8x32xf32, #tpu.memory_space<vmem>>, vector<1x8x32xf32>,
    return
  }
  func.func @transform_0(%arg0: i32) -> (i32, i32, i32) {
    %c0_i32 = arith.constant 0 : i32
    %c0_i32_0 = arith.constant 0 : i32
    %c0_i32_1 = arith.constant 0 : i32
    return %arg0, %c0_i32, %c0_i32_0 : i32, i32, i32
  }
  func.func @transform_1(%arg0: i32) -> (i32, i32) {
    %c0_i32 = arith.constant 0 : i32
    %c0_i32_0 = arith.constant 0 : i32
    %c0_i32_1 = arith.constant 0 : i32
    return %c0_i32, %c0_i32_0 : i32, i32
  }
  func.func @transform_2(%arg0: i32) -> (i32, i32) {
    %c0_i32 = arith.constant 0 : i32
    %c0_i32_0 = arith.constant 0 : i32
    %c0_i32_1 = arith.constant 0 : i32
    return %c0_i32, %c0_i32_0 : i32, i32
  }
  func.func @transform_3(%arg0: i32) -> (i32, i32) {
    %c0_i32 = arith.constant 0 : i32
    %c0_i32_0 = arith.constant 0 : i32
    %c0_i32_1 = arith.constant 0 : i32
    return %c0_i32, %c0_i32_0 : i32, i32
  }
  func.func @transform_4(%arg0: i32) -> (i32, i32) {
    %c0_i32 = arith.constant 0 : i32
    %c0_i32_0 = arith.constant 0 : i32
    %c0_i32_1 = arith.constant 0 : i32
    return %c0_i32, %c0_i32_0 : i32, i32
  }
  func.func @transform_5(%arg0: i32) -> (i32, i32) {
    %c0_i32 = arith.constant 0 : i32
    %c0_i32_0 = arith.constant 0 : i32
    %c0_i32_1 = arith.constant 0 : i32
    return %c0_i32, %c0_i32_0 : i32, i32
  }
  func.func @transform_6(%arg0: i32) -> (i32, i32) {
    %c0_i32 = arith.constant 0 : i32
    %c0_i32_0 = arith.constant 0 : i32
    %c0_i32_1 = arith.constant 0 : i32
    return %c0_i32, %c0_i32_0 : i32, i32
  }
  func.func @transform_7(%arg0: i32) -> (i32, i32) {
    %c0_i32 = arith.constant 0 : i32
    %c0_i32_0 = arith.constant 0 : i32
    %c0_i32_1 = arith.constant 0 : i32
    return %c0_i32, %c0_i32_0 : i32, i32
  }
  func.func @transform_8(%arg0: i32) -> (i32, i32) {
    %c0_i32 = arith.constant 0 : i32
    %c0_i32_0 = arith.constant 0 : i32
    %c0_i32_1 = arith.constant 0 : i32
    return %c0_i32, %c0_i32_0 : i32, i32
  }
  func.func @transform_9(%arg0: i32) -> (i32, i32, i32) {
    %c0_i32 = arith.constant 0 : i32
    %c0_i32_0 = arith.constant 0 : i32
    %c0_i32_1 = arith.constant 0 : i32
    return %arg0, %c0_i32, %c0_i32_0 : i32, i32, i32
  }
}

</mosaic_0001>

<bundles_post_ra>
// kernel: tpu_custom_call.1
= control target key start
LH: loop header
LB: loop body
LE: loop exit
PB: predicated region body
PF: predicated region fallthrough
CT: control target
= control target key end

     0   :  { %s3782_s0 = inlined_call_operand.hbm [shape: f32[2,8,32], index: 0, kind: input, shape index: {}]   ;;  %s3783_s1 = inlined_call_operand.hbm [shape: bf16[32,32], index: 1, kind: input, shape index: {}]   ;;  %s3784_s2 = inlined_call_operand.hbm [shape: bf16[32,32], index: 2, kind: input, shape index: {}]   ;;  %s3785_s3 = inlined_call_operand.hbm [shape: bf16[32,32], index: 3, kind: input, shape index: {}]   ;;  %s3786_s4 = inlined_call_operand.vmem [shape: f32[1,32], index: 4, kind: input, shape index: {}]   ;;  %s3787_s5 = inlined_call_operand.vmem [shape: f32[1,32], index: 5, kind: input, shape index: {}]   ;;  %s3788_s6 = inlined_call_operand.vmem [shape: f32[1,32], index: 6, kind: input, shape index: {}]   ;;  %s3789_s7 = inlined_call_operand.hbm [shape: bf16[32,32], index: 7, kind: input, shape index: {}]   ;;  %s3790_s8 = inlined_call_operand.vmem [shape: f32[1,32], index: 8, kind: input, shape index: {}]   ;;  %s3791_s9 = inlined_call_operand.hbm [shape: f32[2,8,32], index: 9, kind: output, shape index: {}]  }
   0x1   :  { %3796 = sst [smem:[#allocation16_spill]] %s3783_s1 }
   0x2   :  { %3797 = sst [smem:[#allocation17_spill]] %s3784_s2 }
   0x3   :  { %3798 = sst [smem:[#allocation18_spill]] %s3785_s3 }
   0x4   :  { %3799 = sst [smem:[#allocation19_spill]] %s3789_s7 }
   0x5   :  { %14 = vsyncpa [#allocation3], 0 }
   0x6   :  { %16 = vsyncpa [#allocation3 + $0x1], 0 }
   0x7   :  { %17 = vsyncpa [#allocation6], 0 }
   0x8   :  { %18 = vsyncpa [#allocation9], 0 }
   0x9   :  { %19 = vsyncpa [#allocation4], 0 }
   0xa   :  { %21 = vsyncpa [#allocation4 + $0x1], 0  ;;  %s3323_s30 = smov 0   ;;  %s3325_s10 = smov 0  }
   0xb   :  { %s3327_s11 = smov 0   ;;  %s3329_s12 = smov 0  }
   0xc LB: > { %s3254_s13 = smov [#allocation5]   ;;  %s3344_s15 = sadd.s32 4294967295, %s3252_s12   ;;  %s3252_s12 = sphi %s3329_s12, %s3823_s12   ;;  %s3248_s11 = sphi %s3327_s11, %s3822_s11   ;;  %s3244_s10 = sphi %s3325_s10, %s3821_s10   ;;  %s3240_s30 = sphi %s3323_s30, %s3820_s30  }
   0xd   : > { %s264_s14 = sshll.u32 %s3254_s13, 4  ;;  %p2769_p0 = scmp.ge.s32.totalorder %s3252_s12, 1  ;;  %s265_s14 = int_to_ptr.vmem [resolvable:$true] %s264_s14 }
   0xe   : > { %p3792_p1 = scmp.eq.s32.totalorder %s3344_s15, 0  ;;  %p252_p2 = scmp.lt.s32.totalorder %s3252_s12, 3 }
   0xf   : > { %s3255_s17 = smov [#allocation8]   ;;  %s3256_s20 = smov [#allocation7]  }
  0x10   : > { %p3349_p3 = pnand %p2769_p0, %p252_p2  ;;  %s290_s18 = sshll.u32 %s3255_s17, 4  ;;  %s3362_s18 = int_to_ptr.vmem [resolvable:$true] %s290_s18 }
  0x11   : > { %s277_s21 = sshll.u32 %s3256_s20, 4  ;;  %s3059_s22 = scalar_lea.vmem %s265_s14, 256  ;;  %s3364_s21 = int_to_ptr.vmem [resolvable:$true] %s277_s21 }
  0x12   : > { %s3800_s16 = scalar_select %p3349_p3, 1, 0 }
  0x13   : > { %p2944_p5 = pneg %p3349_p3  ;;  %p3060_p8 = scmp.ne.s32.totalorder %s265_s14, %s3059_s22 }
  0x14   : > { %p3067_p11 = scmp.lt.s32.totalorder %s265_s14, %s265_s14  ;;  %p3068_p12 = scmp.lt.s32.totalorder %s3059_s22, %s3059_s22 }
  0x15   : > { %p3358_p6 = pnand %p2944_p5, %p3792_p1 }
  0x16   : > { %p3069_p13 = por %p3068_p12, %p3067_p11 }
  0x17   : > { %p3050_p7 = pneg %p3358_p6 }
  0x19   : > { %p3062_p9 = pnand %p3060_p8, %p3050_p7 }
  0x1b   : > { %p3063_p10 = pneg %p3062_p9 }
  0x1d   : > { %p3070_p0 = pnand %p3069_p13, %p3063_p10 }
  0x1f   : > { %3073 = shalt.err (!%p3070_p0)
}
  0x20   : > { %s3257_s23 = smov 64   ;;  %s3258_s24 = smov 4  }
  0x21   : > { %s3802_s1 = sld [smem:[#allocation16_spill]]  ;;  %s3085_s27 = scalar_lea.vmem %s3362_s18, 256 }
  0x22   : > { %p3086_p2 = scmp.ne.s32.totalorder %s3362_s18, %s3085_s27  ;;  %p3093_p9 = scmp.lt.s32.totalorder %s3362_s18, %s3362_s18 }
  0x23   : > { %p3094_p10 = scmp.lt.s32.totalorder %s3085_s27, %s3085_s27 }
  0x24   : > { %p3088_p5 = pnand %p3086_p2, %p3050_p7 }
  0x25   : > { %p3095_p11 = por %p3094_p10, %p3093_p9 }
  0x26   : > { %p3089_p8 = pneg %p3088_p5 }
  0x27   : > { %2947 = dma.hbm_to_vmem [thread:$0]  (!%p3358_p6), %s3802_s1, 256, %s265_s14, [#allocation6], %s3257_s23, %s3257_s23, %s3258_s24  }
  0x28   : > { %p3096_p12 = pnand %p3095_p11, %p3089_p8 }
  0x2a   : > { %3099 = shalt.err (!%p3096_p12)
}
  0x2b   : > { %s3803_s3 = sld [smem:[#allocation18_spill]]  ;;  %s3111_s13 = scalar_lea.vmem %s3364_s21, 256 }
  0x2c   : > { %p3112_p13 = scmp.ne.s32.totalorder %s3364_s21, %s3111_s13  ;;  %p3119_p5 = scmp.lt.s32.totalorder %s3364_s21, %s3364_s21 }
  0x2d   : > { %p3120_p8 = scmp.lt.s32.totalorder %s3111_s13, %s3111_s13 }
  0x2e   : > { %p3114_p0 = pnand %p3112_p13, %p3050_p7 }
  0x2f   : > { %p3121_p9 = por %p3120_p8, %p3119_p5 }
  0x30   : > { %p3115_p2 = pneg %p3114_p0 }
  0x31   : > { %2953 = dma.hbm_to_vmem [thread:$0]  (!%p3358_p6), %s3803_s3, 256, %s3362_s18, [#allocation9], %s3257_s23, %s3257_s23, %s3258_s24  }
  0x32   : > { %p3122_p10 = pnand %p3121_p9, %p3115_p2 }
  0x34   : > { %3125 = shalt.err (!%p3122_p10)
}
  0x35   : > { %s3804_s2 = sld [smem:[#allocation17_spill]]  ;;  %s3259_s18 = smov [#allocation10]  }
  0x36   : > { %s312_s20 = sshll.u32 %s3259_s18, 4  ;;  %s313_s20 = int_to_ptr.vmem [resolvable:$true] %s312_s20 }
  0x37   : > { %s3137_s22 = scalar_lea.vmem %s313_s20, 256  ;;  %p3145_p0 = scmp.lt.s32.totalorder %s313_s20, %s313_s20 }
  0x38   : > { %p3138_p11 = scmp.ne.s32.totalorder %s313_s20, %s3137_s22  ;;  %p3146_p2 = scmp.lt.s32.totalorder %s3137_s22, %s3137_s22 }
  0x3a   : > { %p3140_p12 = pnand %p3138_p11, %p3050_p7  ;;  %p3147_p5 = por %p3146_p2, %p3145_p0 }
  0x3b   : > { %2950 = dma.hbm_to_vmem [thread:$0]  (!%p3358_p6), %s3804_s2, 256, %s3364_s21, [#allocation6], %s3257_s23, %s3257_s23, %s3258_s24  }
  0x3c   : > { %p3141_p13 = pneg %p3140_p12 }
  0x3e   : > { %p3148_p8 = pnand %p3147_p5, %p3141_p13 }
  0x40   : > { %3151 = shalt.err (!%p3148_p8)
}
  0x41   : > { %s3805_s7 = sld [smem:[#allocation19_spill]]  ;;  %s2768_s19 = sadd.s32 4294967294, %s3252_s12  }
  0x42   : > { %s3424_s26 = sadd.s32 1, %s3252_s12   ;;  %s34_s28 = sadd.s32 1, %s3248_s11 }
  0x43   : > { %s31_s27 = ssub.s32 %s3252_s12, %s3424_s26  ;;  %p41_p9 = scmp.ne.s32.totalorder %s3248_s11, %s3244_s10 }
  0x44   : > { %p32_p7 = scmp.eq.s32.totalorder %s31_s27, 0  ;;  %p42_p10 = scmp.eq.s32.totalorder %s3252_s12, 0 }
  0x45   : > { %p47_p11 = scmp.ne.s32.totalorder %s3244_s10, %s3240_s30  ;;  %p239_p13 = scmp.eq.s32.totalorder %s3344_s15, 1 }
  0x46   : > { %s3435_s29 = scalar_select %p32_p7, %s3248_s11, %s34_s28  }
  0x47   : > { %2956 = dma.hbm_to_vmem [thread:$0]  (!%p3358_p6), %s3805_s7, 256, %s313_s20, [#allocation9], %s3257_s23, %s3257_s23, %s3258_s24  }
  0x48   : > { %p3437_p12 = por %p42_p10, %p41_p9  ;;  %p3443_p6 = por %p3792_p1, %p47_p11 }
  0x49   : > { %p245_p0 = scmp.eq.s32.totalorder %s2768_s19, 1  ;;  %p2969_p2 = scmp.lt.s32.totalorder %s3252_s12, 2 }
  0x4a   : > { %s3807_s23 = scalar_select %p3443_p6, 1, 0 }
  0x4b   : > { %s329_s24 = sand.u32 1, %s3248_s11   ;;  %p3450_p5 = por %p239_p13, %p41_p9 }
  0x4c   : > { %p3454_p8 = por %p245_p0, %p47_p11  ;;  %s2775_s18 = sshll.u32 %s329_s24, 3 }
  0x4d   : > { %s3808_s14 = scalar_select %p3450_p5, 1, 0 }
  0x4e   : > { %s3809_s17 = scalar_select %p3454_p8, 1, 0 }
  0x4f   : > { %s2776_s20 = sshll.u32 %s3252_s12, 7  ;;  %s333_s19 = scalar_lea.vmem [#allocation2], %s2775_s18 }
  0x50   : > { %s3462_s25 = scalar_lea.hbm %s3782_s0, %s2776_s20  ;;  %s340_s27 = sshll.u32 %s333_s19, 4  ;;  %s341_s27 = int_to_ptr.vmem [resolvable:$true] %s340_s27 }
  0x51   : > { %p3466_p7 = pnand %p2969_p2, %p3437_p12  ;;  %s330_s1 = scalar_lea.sflag [#allocation3], %s329_s24 }
  0x52   : > { %s3152_s2 = scalar_lea.hbm %s3462_s25, 128  ;;  %s3157_s21 = scalar_lea.hbm %s3782_s0, 256 }
  0x53   : > { %p3153_p9 = scmp.ne.s32.totalorder %s3462_s25, %s3152_s2  ;;  %p3154_p10 = pneg %p3466_p7 }
  0x54   : > { %p3158_p0 = scmp.lt.s32.totalorder %s3462_s25, %s3782_s0  ;;  %p3159_p12 = scmp.lt.s32.totalorder %s3157_s21, %s3152_s2 }
  0x55   : > { %p3155_p11 = pnand %p3154_p10, %p3153_p9 }
  0x56   : > { %p3160_p2 = por %p3159_p12, %p3158_p0 }
  0x57   : > { %p3156_p13 = pneg %p3155_p11 }
  0x59   : > { %p3161_p4 = pnand %p3160_p2, %p3156_p13 }
  0x5b   : > { %3164 = shalt.err (!%p3161_p4)
}
  0x5c   : > { %s3165_s13 = scalar_lea.vmem %s341_s27, 128  ;;  %s3260_s24 = smov [#allocation2]  }
  0x5d   : > { %p3166_p1 = scmp.ne.s32.totalorder %s341_s27, %s3165_s13  ;;  %s3170_s3 = sshll.u32 %s3260_s24, 4  ;;  %s3171_s3 = int_to_ptr.vmem [resolvable:$false] %s3170_s3 }
  0x5e   : > { %s3172_s7 = scalar_lea.vmem %s3171_s3, 256  ;;  %p3173_p9 = scmp.lt.s32.totalorder %s341_s27, %s3171_s3 }
  0x5f   : > { %p3168_p8 = pnand %p3166_p1, %p3154_p10  ;;  %p3174_p11 = scmp.lt.s32.totalorder %s3172_s7, %s3165_s13 }
  0x61   : > { %p3169_p5 = pneg %p3168_p8  ;;  %p3175_p6 = por %p3174_p11, %p3173_p9 }
  0x63   : > { %p3176_p3 = pnand %p3175_p6, %p3169_p5 }
  0x65   : > { %3179 = shalt.err (!%p3176_p3)
}
  0x66   : > { %2960 = dma.hbm_to_vmem [thread:$0]  (!%p3466_p7), %s3462_s25, 128, %s341_s27, %s330_s1  }
  0x67   : > { %p3811_p13 = scmp.ne.s32.totalorder %s3800_s16, 0 }
  0x68   : > { %s3487_s2 = sand.u32 (!%p3811_p13), 1, %s3244_s10   ;;  %p3812_p1 = scmp.ne.s32.totalorder (!%p3811_p13), %s3807_s23, 0 }
  0x69   : > { %349 = sbr.rel (%p3811_p13) target bundleno = 1942 (0x796), region = 56  ;;  %s2778_s20 = sshll.u32 (!%p3811_p13), %s3487_s2, 3 }
  0x6a   : > { %s352_s3 = scalar_lea.sflag (!%p3811_p13), [#allocation3], %s3487_s2  ;;  %s355_s7 = scalar_lea.vmem (!%p3811_p13), [#allocation2], %s2778_s20 }
  0x6e   : > { %3223 = dma.done.wait (%p3812_p1), %s352_s3, 128  }
  0x6f   : > { %3225 = vsyncadd (%p3812_p1), %s352_s3, 4294967168  ;;  %p3813_p3 = scmp.eq.s32.totalorder %s3344_s15, 0 }
  0x71   : > { %3227 = dma.done.wait (%p3813_p3), [#allocation6], 512   ;;  %p3814_p4 = pmov %p3813_p3 }
  0x72   : > { %p3815_p6 = pmov %p3813_p3 }
  0x73   : > { %3229 = vsyncadd (%p3814_p4), [#allocation6], 4294966784 }
  0x74   : > { %3231 = dma.done.wait (%p3815_p6), [#allocation9], 512   ;;  %p3816_p5 = pmov %p3813_p3 }
  0x75   : > { %v3261_v0 = vmov 0.0   ;;  %vm3262_vm0 = vmmov 0   ;;  %v3024_v1 = vld [vmem:[#allocation7 + $0x8] sm:$0xff]   ;;  %v3025_v2 = vld [vmem:[#allocation7] sm:$0xff]   ;;  %v3026_v4 = vld [vmem:[#allocation5 + $0x8] sm:$0xff]   ;;  %vm432_vm1 = vcmask 261120   ;;  %v617_v21 = vlaneseq }
  0x76   : > { %3233 = vsyncadd (%p3816_p5), [#allocation9], 4294966784  ;;  %2852 = vmatprep.subr.bf16.mxu1 %v3261_v0  ;;  %2856 = vmatprep.mubr.msk.bf16.mxu1 %vm3262_vm0, %v3261_v0  ;;  %v407_v3 = vld [vmem:[%s355_s7] sm:$0xff]  ;;  %v3027_v5 = vld [vmem:[#allocation5] sm:$0xff]   ;;  %s3263_s23 = smov 104   ;;  %s3264_s25 = smov 120  }
  0x77   : > { %2844 = vmatprep.subr.bf16.mxu0 %v3261_v0  ;;  %2848 = vmatprep.mubr.msk.bf16.mxu0 %vm3262_vm0, %v3261_v0  ;;  %v408_v6 = vpack.c.bf16 %v407_v3, %v407_v3  ;;  %v3028_v7 = vld [vmem:[#allocation8 + $0x8] sm:$0xff]   ;;  %v3029_v8 = vld [vmem:[#allocation8] sm:$0xff]   ;;  %v2788_v9 = vld [vmem:[%s3787_s5] ss:$0 sm:$0xff]  ;;  %s3265_s27 = smov 112   ;;  %v3533_v25 = vshrl.u32 %v617_v21, 7 }
  0x78   : > { %2853 = vmatpush3.bf16.msra.mxu1 %v3024_v1  ;;  %2845 = vmatpush3.bf16.msra.mxu0 %v3026_v4  ;;  %v3266_v19 = vmov 1983009808   ;;  %v3267_v22 = vmov 1934713408   ;;  %v2784_v58 = vld [vmem:[%s3786_s4] ss:$0 sm:$0xff] }
  0x79   : > { %2854 = vmatprep.subr.bf16.mxu1 %v3261_v0  ;;  %2846 = vmatprep.subr.bf16.mxu0 %v3261_v0  ;;  %v615_v20 = vunpack.c.l.s4 %v3266_v19  ;;  %v647_v23 = vunpack.c.l.s4 %v3267_v22  ;;  %vm1344_vm2 = vcmask 1043456   ;;  %vm1340_vm3 = vcmask 64512   ;;  %s3269_s19 = smov 16   ;;  %s3270_s13 = smov 8  }
  0x7a   : > { %vm1588_vm4 = vcmask 1041409   ;;  %vm1590_vm5 = vcmask 1042434   ;;  %vm1592_vm6 = vcmask 1043459   ;;  %s3271_s24 = smov 24   ;;  %vm2574_vm7 = vcmask 130048   ;;  %s2813_s1 = sshll.u32 %s3344_s15, 7 }
  0x7b   : > { %v616_v24 = vunpack.c.0.s8 %v615_v20  ;;  %v648_v28 = vunpack.c.0.s8 %v647_v23  ;;  %vm2576_vm8 = vcmask 195584   ;;  %s405_s16 = scalar_lea.vmem [#allocation11], %s2778_s20  ;;  %s3738_s28 = scalar_lea.hbm %s3791_s9, %s2813_s1 }
  0x7c   : > { %2855 = vmatpush3.bf16.msra.mxu1 %v3025_v2  ;;  %2847 = vmatpush3.bf16.msra.mxu0 %v3027_v5  ;;  %s2647_s15 = scalar_lea.sflag [#allocation4], %s3487_s2  ;;  %p3817_p7 = scmp.ne.s32.totalorder %s3808_s14, 0 }
  0x7d   : > { %2868 = vmatprep.subr.bf16.mxu1 %v3261_v0  ;;  %2860 = vmatprep.subr.bf16.mxu0 %v3261_v0  ;;  %v3536_v29 = vsub.s32 %v616_v24, %v3533_v25  ;;  %v3539_v35 = vsub.s32 %v648_v28, %v3533_v25  ;;  %s3272_s20 = smov [#allocation11]  }
  0x7e   : > { %s3184_s21 = sshll.u32 %s3272_s20, 4  ;;  %s3185_s21 = int_to_ptr.vmem [resolvable:$false] %s3184_s21 }
  0x7f   : > { %2857 = vmatmul.mubr.msk.bf16.vlgmr.msra.gmra.mxu1 %vm432_vm1, %v408_v6  ;;  %2849 = vmatmul.mubr.msk.bf16.vlgmr.msra.gmra.mxu0 %vm432_vm1, %v408_v6  ;;  %s3186_s18 = scalar_lea.vmem %s3185_s21, 256 }
  0x80   : > { %2870 = vmatprep.mubr.msk.bf16.mxu1 %vm3262_vm0, %v3261_v0  ;;  %2864 = vmatprep.mubr.msk.bf16.mxu0 %vm3262_vm0, %v3261_v0 }
  0x81   : > { %2861 = vmatpush3.bf16.msra.mxu0 %v3028_v7 }
  0x82   : > { %2862 = vmatprep.subr.bf16.mxu0 %v3261_v0 }
  0x85   : > { %2863 = vmatpush3.bf16.msra.mxu0 %v3029_v8 }
  0x86   : > { %2874 = vmatprep.subr.bf16.mxu0 %v3261_v0 }
  0x88   : > { %2865 = vmatmul.mubr.msk.bf16.vlgmr.msra.gmra.mxu0 %vm432_vm1, %v408_v6 }
  0x89   : > { %2876 = vmatprep.mubr.msk.bf16.mxu0 %vm3262_vm0, %v3261_v0 }
 0x13f   : > { %v533_v10 = vpop.f32.mrf.mxu1  ;;  %v470_v15 = vpop.f32.mrf.mxu0 }
 0x140   : > { %v534_v11 = vadd.f32 %v2788_v9, %v533_v10  ;;  %v3556_v61 = vadd.f32 %v2784_v58, %v470_v15 }
 0x141   : > { %v2858_v12 = vpop.f32.mrf.mxu1  ;;  %v2850_v16 = vpop.f32.mrf.mxu0 }
 0x142   : > { %695 = vrot.lane.b32.xlu1 %v534_v11, %s3263_s23  ;;  %689 = vrot.lane.b32.xlu0 %v534_v11, %s3264_s25 }
 0x143   : > { %v536_v13 = vpop.f32.mrf.mxu1  ;;  %v473_v17 = vpop.f32.mrf.mxu0 }
 0x145   : > { %v2859_v14 = vpop.f32.mrf.mxu1  ;;  %v2851_v18 = vpop.f32.mrf.mxu0 }
 0x146   : > { %692 = vrot.lane.b32.xlu0 %v534_v11, %s3265_s27 }
 0x148   : > { %v596_v62 = vpop.f32.mrf.mxu0 }
 0x14a   : > { %v2866_v63 = vpop.f32.mrf.mxu0 }
 0x14c   : > { %v599_v1 = vpop.f32.mrf.mxu0 }
 0x14e   : > { %v2867_v2 = vpop.f32.mrf.mxu0 }
 0x1b4   : > { %v696_v26 = vpop.permute.xlu1 %695  ;;  %v690_v27 = vpop.permute.xlu0 %689 }
 0x1b5   : > { %v714_v30 = vcombine.low %v690_v27, %v696_v26  ;;  %v715_v31 = vcombine.high %v690_v27, %v696_v26 }
 0x1b7   : > { %v722_v36 = vrot.slane %v714_v30, %v3536_v29  ;;  %v729_v37 = vrot.slane %v715_v31, %v3536_v29 }
 0x1b8   : > { %v693_v32 = vpop.permute.xlu0 %692 }
 0x1b9   : > { %v698_v33 = vcombine.low %v534_v11, %v693_v32  ;;  %v699_v34 = vcombine.high %v534_v11, %v693_v32 }
 0x1bb   : > { %v706_v38 = vrot.slane %v698_v33, %v3536_v29  ;;  %v713_v39 = vrot.slane %v699_v34, %v3536_v29  ;;  %v3268_v33 = vmov 0  }
 0x1bd   : > { %v731_v40 = vcombine.high %v706_v38, %v722_v36  ;;  %v730_v41 = vcombine.low %v706_v38, %v722_v36  ;;  %v746_v42 = vcombine.low %v713_v39, %v729_v37  ;;  %v747_v45 = vcombine.high %v713_v39, %v729_v37 }
 0x1bf   : > { %v745_v43 = vrot.slane %v731_v40, %v3539_v35  ;;  %v738_v44 = vrot.slane %v730_v41, %v3539_v35  ;;  %v754_v48 = vrot.slane %v746_v42, %v3539_v35  ;;  %v761_v52 = vrot.slane %v747_v45, %v3539_v35 }
 0x1c1   : > { %v768_v46 = vpack.c.bf16 %v745_v43, %v745_v43  ;;  %v766_v47 = vpack.c.bf16 %v738_v44, %v738_v44  ;;  %v763_v49 = vcombine.high %v745_v43, %v3261_v0  ;;  %v770_v50 = vpack.c.bf16 %v754_v48, %v754_v48 }
 0x1c2   : > { %v764_v53 = vcombine.high %v754_v48, %v3261_v0  ;;  %v772_v54 = vpack.c.bf16 %v761_v52, %v761_v52  ;;  %v765_v56 = vcombine.high %v761_v52, %v3261_v0  ;;  %v762_v57 = vcombine.high %v738_v44, %v3261_v0  ;;  %v2792_v44 = vld [vmem:[%s3788_s6] ss:$0 sm:$0xff] }
 0x1c3   : > { %954 = vxpose.xlu0.c.b16.start.end [1/1] (short) (narrow) %v768_v46, 16  ;;  %922 = vxpose.xlu1.c.b16.start.end [1/1] (short) (narrow) %v766_v47, 16  ;;  %v769_v51 = vpack.c.bf16 %v763_v49, %v763_v49  ;;  %v3579_v49 = vadd.f32 %v2792_v44, %v596_v62 }
 0x1c4   : > { %v771_v55 = vpack.c.bf16 %v764_v53, %v764_v53  ;;  %v773_v59 = vpack.c.bf16 %v765_v56, %v765_v56  ;;  %v767_v60 = vpack.c.bf16 %v762_v57, %v762_v57 }
 0x1c7   : > { %986 = vxpose.xlu0.c.b16.start.end [1/1] (short) (narrow) %v770_v50, 16  ;;  %970 = vxpose.xlu1.c.b16.start.end [1/1] (short) (narrow) %v769_v51, 16 }
 0x1cb   : > { %1018 = vxpose.xlu0.c.b16.start.end [1/1] (short) (narrow) %v772_v54, 16  ;;  %1002 = vxpose.xlu1.c.b16.start.end [1/1] (short) (narrow) %v771_v55, 16 }
 0x1cf   : > { %1034 = vxpose.xlu1.c.b16.start.end [1/1] (short) (narrow) %v773_v59, 16  ;;  %938 = vxpose.xlu0.c.b16.start.end [1/1] (short) (narrow) %v767_v60, 16 }
 0x1d3   : > { %606 = vrot.lane.b32.xlu1 %v3556_v61, %s3265_s27 }
 0x1d7   : > { %609 = vrot.lane.b32.xlu1 %v3556_v61, %s3263_s23 }
 0x1d8   : > { %603 = vrot.lane.b32.xlu0 %v3556_v61, %s3264_s25 }
 0x225   : > { %v962_v3 = vpop.trf.xlu0  ;;  %v930_v4 = vpop.trf.xlu1 }
 0x229   : > { %v994_v5 = vpop.trf.xlu0  ;;  %v978_v6 = vpop.trf.xlu1 }
 0x22a   : > { %v1050_v9 = vcombine.low %v930_v4, %v994_v5 }
 0x22c   : > { %v1057_v14 = vrot.slane %v1050_v9, %v3536_v29 }
 0x22d   : > { %v1026_v7 = vpop.trf.xlu0  ;;  %v1010_v8 = vpop.trf.xlu1 }
 0x22e   : > { %v1058_v10 = vcombine.low %v962_v3, %v1026_v7 }
 0x230   : > { %v1065_v11 = vrot.slane %v1058_v10, %v3536_v29 }
 0x231   : > { %v1042_v12 = vpop.trf.xlu1  ;;  %v946_v13 = vpop.trf.xlu0 }
 0x232   : > { %v1092_v15 = vcombine.low %v978_v6, %v1042_v12  ;;  %v1084_v16 = vcombine.low %v946_v13, %v1010_v8  ;;  %v1066_v17 = vcombine.low %v1057_v14, %v1065_v11  ;;  %v1067_v18 = vcombine.high %v1057_v14, %v1065_v11 }
 0x234   : > { %v1099_v19 = vrot.slane %v1092_v15, %v3536_v29  ;;  %v1091_v20 = vrot.slane %v1084_v16, %v3536_v29  ;;  %v1074_v24 = vrot.slane %v1066_v17, %v3539_v35  ;;  %v1081_v26 = vrot.slane %v1067_v18, %v3539_v35 }
 0x236   : > { %v1100_v22 = vcombine.low %v1091_v20, %v1099_v19  ;;  %v1101_v23 = vcombine.high %v1091_v20, %v1099_v19  ;;  %v1122_v36 = vshrl.u32 %v1074_v24, 16  ;;  %v1082_v37 = vcombine.high %v1074_v24, %v3268_v33 }
 0x237   : > { %v1083_v42 = vcombine.high %v1081_v26, %v3268_v33  ;;  %v1138_v43 = vshrl.u32 %v1081_v26, 16 }
 0x238   : > { %v1108_v27 = vrot.slane %v1100_v22, %v3539_v35  ;;  %v1115_v28 = vrot.slane %v1101_v23, %v3539_v35  ;;  %v1130_v48 = vshrl.u32 %v1082_v37, 16 }
 0x239   : > { %v1146_v52 = vshrl.u32 %v1083_v42, 16 }
 0x23a   : > { %v1136_v30 = vpack.i.b16 %v1115_v28, %v1081_v26  ;;  %v1120_v31 = vpack.i.b16 %v1108_v27, %v1074_v24  ;;  %v1123_v32 = vshrl.u32 %v1108_v27, 16  ;;  %v1116_v34 = vcombine.high %v1108_v27, %v3268_v33 }
 0x23b   : > { %v1117_v40 = vcombine.high %v1115_v28, %v3268_v33  ;;  %v1139_v41 = vshrl.u32 %v1115_v28, 16 }
 0x23c   : > { %1214 = vxpose.xlu1.c.b16.start.end [1/1] (short) (narrow) %v1136_v30, 16  ;;  %1150 = vxpose.xlu0.c.b16.start.end [1/1] (short) (narrow) %v1120_v31, 16  ;;  %v1124_v38 = vpack.i.b16 %v1123_v32, %v1122_v36  ;;  %v1128_v39 = vpack.i.b16 %v1116_v34, %v1082_v37  ;;  %v1131_v47 = vshrl.u32 %v1116_v34, 16 }
 0x23d   : > { %v1144_v45 = vpack.i.b16 %v1117_v40, %v1083_v42  ;;  %v1140_v46 = vpack.i.b16 %v1139_v41, %v1138_v43  ;;  %v1147_v51 = vshrl.u32 %v1117_v40, 16 }
 0x23e   : > { %v1132_v50 = vpack.i.b16 %v1131_v47, %v1130_v48 }
 0x23f   : > { %v1148_v53 = vpack.i.b16 %v1147_v51, %v1146_v52 }
 0x240   : > { %1166 = vxpose.xlu1.c.b16.start.end [1/1] (short) (narrow) %v1124_v38, 16  ;;  %1182 = vxpose.xlu0.c.b16.start.end [1/1] (short) (narrow) %v1128_v39, 16 }
 0x244   : > { %1246 = vxpose.xlu1.c.b16.start.end [1/1] (short) (narrow) %v1144_v45, 16  ;;  %1230 = vxpose.xlu0.c.b16.start.end [1/1] (short) (narrow) %v1140_v46, 16 }
 0x245   : > { %v607_v54 = vpop.permute.xlu1 %606 }
 0x246   : > { %v612_v59 = vcombine.low %v3556_v61, %v607_v54  ;;  %v613_v60 = vcombine.high %v3556_v61, %v607_v54 }
 0x248   : > { %1198 = vxpose.xlu0.c.b16.start.end [1/1] (short) (narrow) %v1132_v50, 16  ;;  %775 = vrot.lane.b32.xlu1 %v3579_v49, %s3264_s25  ;;  %v620_v1 = vrot.slane %v612_v59, %v3536_v29  ;;  %v627_v2 = vrot.slane %v613_v60, %v3536_v29 }
 0x249   : > { %v610_v55 = vpop.permute.xlu1 %609 }
 0x24a   : > { %v604_v56 = vpop.permute.xlu0 %603 }
 0x24b   : > { %v628_v57 = vcombine.low %v604_v56, %v610_v55  ;;  %v629_v58 = vcombine.high %v604_v56, %v610_v55 }
 0x24c   : > { %1262 = vxpose.xlu0.c.b16.start.end [1/1] (short) (narrow) %v1148_v53, 16  ;;  %781 = vrot.lane.b32.xlu1 %v3579_v49, %s3263_s23  ;;  %s2660_s23 = sshll.u32 %s405_s16, 4  ;;  %s3740_s23 = int_to_ptr.vmem [resolvable:$true] %s2660_s23 }
 0x24d   : > { %v636_v62 = vrot.slane %v628_v57, %v3536_v29  ;;  %v643_v63 = vrot.slane %v629_v58, %v3536_v29  ;;  %s3180_s22 = scalar_lea.vmem %s3740_s23, 128  ;;  %p3187_p12 = scmp.lt.s32.totalorder %s3740_s23, %s3185_s21 }
 0x24e   : > { %p3181_p8 = scmp.ne.s32.totalorder %s3740_s23, %s3180_s22  ;;  %p3188_p2 = scmp.lt.s32.totalorder %s3186_s18, %s3180_s22 }
 0x24f   : > { %v644_v3 = vcombine.low %v620_v1, %v636_v62  ;;  %v645_v4 = vcombine.high %v620_v1, %v636_v62  ;;  %v660_v5 = vcombine.low %v627_v2, %v643_v63  ;;  %v661_v6 = vcombine.high %v627_v2, %v643_v63 }
 0x250   : > { %p3182_p10 = pnand %p3181_p8, %p3817_p7  ;;  %p3189_p9 = por %p3188_p2, %p3187_p12 }
 0x251   : > { %v652_v9 = vrot.slane %v644_v3, %v3539_v35  ;;  %v659_v10 = vrot.slane %v645_v4, %v3539_v35  ;;  %v668_v61 = vrot.slane %v660_v5, %v3539_v35  ;;  %v675_v11 = vrot.slane %v661_v6, %v3539_v35 }
 0x252   : > { %p3183_p0 = pneg %p3182_p10 }
 0x253   : > { %v676_v14 = vcombine.high %v652_v9, %v3261_v0  ;;  %v677_v15 = vcombine.high %v659_v10, %v3261_v0  ;;  %v678_v16 = vcombine.high %v668_v61, %v3261_v0  ;;  %v679_v17 = vcombine.high %v675_v11, %v3261_v0 }
 0x254   : > { %v2796_v27 = vpack.c.bf16 %v668_v61, %v652_v9  ;;  %v2797_v28 = vpack.c.bf16 %v675_v11, %v659_v10  ;;  %p3190_p11 = pnand %p3189_p9, %p3183_p0 }
 0x255   : > { %778 = vrot.lane.b32.xlu0 %v3579_v49, %s3265_s27  ;;  %v2798_v23 = vpack.c.bf16 %v678_v16, %v676_v14  ;;  %v2799_v24 = vpack.c.bf16 %v679_v17, %v677_v15 }
 0x256   : > { %v867_v38 = vrot.slane %v2796_v27, %v3536_v29  ;;  %v875_v39 = vrot.slane %v2797_v28, %v3536_v29 }
 0x257   : > { %v892_v32 = vrot.slane %v2798_v23, %v3536_v29  ;;  %v900_v34 = vrot.slane %v2799_v24, %v3536_v29 }
 0x258   : > { %v876_v46 = vcombine.low %v867_v38, %v875_v39 }
 0x259   : > { %v901_v42 = vcombine.low %v892_v32, %v900_v34 }
 0x25a   : > { %v883_v52 = vrot.slane %v876_v46, %v3539_v35 }
 0x25b   : > { %v908_v48 = vrot.slane %v901_v42, %v3539_v35 }
 0x25c   : > { %v913_v3 = vshrl.u32 %v883_v52, 16  ;;  %v884_v10 = vcombine.high %v883_v52, %v3268_v33 }
 0x25d   : > { %v914_v57 = vshrl.u32 %v908_v48, 16  ;;  %v912_v2 = vpack.i.b16 %v908_v48, %v883_v52 }
 0x29e   : > { %v1222_v7 = vpop.trf.xlu1  ;;  %v1158_v8 = vpop.trf.xlu0 }
 0x29f   : > { %v1278_v18 = vcombine.low %v1158_v8, %v1222_v7  ;;  %v915_v7 = vpack.i.b16 %v914_v57, %v913_v3  ;;  %v909_v8 = vcombine.high %v908_v48, %v3268_v33 }
 0x2a1   : > { %v1285_v30 = vrot.slane %v1278_v18, %v3536_v29  ;;  %v920_v61 = vshrl.u32 %v909_v8, 16 }
 0x2a2   : > { %v1174_v12 = vpop.trf.xlu1  ;;  %v1190_v13 = vpop.trf.xlu0 }
 0x2a6   : > { %v1254_v19 = vpop.trf.xlu1  ;;  %v1238_v20 = vpop.trf.xlu0 }
 0x2a7   : > { %v1286_v22 = vcombine.low %v1190_v13, %v1254_v19  ;;  %v1303_v37 = vcombine.low %v1174_v12, %v1238_v20  ;;  %v918_v12 = vpack.i.b16 %v909_v8, %v884_v10  ;;  %v919_v13 = vshrl.u32 %v884_v10, 16 }
 0x2a9   : > { %v1293_v26 = vrot.slane %v1286_v22, %v3536_v29  ;;  %v1310_v44 = vrot.slane %v1303_v37, %v3536_v29  ;;  %v921_v15 = vpack.i.b16 %v920_v61, %v919_v13 }
 0x2aa   : > { %v1206_v31 = vpop.trf.xlu0 }
 0x2ab   : > { %v1294_v36 = vcombine.low %v1285_v30, %v1293_v26 }
 0x2ad   : > { %v1301_v43 = vrot.slane %v1294_v36, %v3539_v35 }
 0x2ae   : > { %v1270_v40 = vpop.trf.xlu0 }
 0x2af   : > { %v1311_v41 = vcombine.low %v1206_v31, %v1270_v40  ;;  %v1302_v50 = vcombine.high %v1301_v43, %v3268_v33  ;;  %v1331_v54 = vshrl.u32 %v1301_v43, 16 }
 0x2b1   : > { %v1318_v45 = vrot.slane %v1311_v41, %v3536_v29  ;;  %v1337_v58 = vshrl.u32 %v1302_v50, 16 }
 0x2b3   : > { %v1319_v47 = vcombine.low %v1310_v44, %v1318_v45 }
 0x2b5   : > { %v1326_v51 = vrot.slane %v1319_v47, %v3539_v35 }
 0x2b7   : > { %v1330_v53 = vpack.i.b16 %v1326_v51, %v1301_v43  ;;  %v1332_v55 = vshrl.u32 %v1326_v51, 16  ;;  %v1327_v56 = vcombine.high %v1326_v51, %v3268_v33 }
 0x2b9   : > { %v1346_v59 = vsel %vm1344_vm2, %v1330_v53, 0  ;;  %v1333_v60 = vpack.i.b16 %v1332_v55, %v1331_v54  ;;  %v1336_v62 = vpack.i.b16 %v1327_v56, %v1302_v50  ;;  %v1338_v63 = vshrl.u32 %v1327_v56, 16 }
 0x2ba   : > { %2869 = vmatpush3.bf16.msra.mxu1 %v1346_v59  ;;  %v776_v5 = vpop.permute.xlu1 %775 }
 0x2bb   : > { %v1392_v1 = vsel %vm1344_vm2, %v1333_v60, 0  ;;  %2880 = vmatprep.subr.bf16.mxu1 %v3261_v0  ;;  %v1339_v4 = vpack.i.b16 %v1338_v63, %v1337_v58  ;;  %v1438_v6 = vsel %vm1344_vm2, %v1336_v62, 0 }
 0x2bc   : > { %2875 = vmatpush3.bf16.msra.mxu0 %v1392_v1 }
 0x2bd   : > { %2871 = vmatmul.mubr.msk.bf16.vlgmr.msra.gmra.mxu1 %vm1340_vm3, %v912_v2  ;;  %2886 = vmatprep.subr.bf16.mxu0 %v3261_v0  ;;  %v1484_v9 = vsel %vm1344_vm2, %v1339_v4, 0 }
 0x2be   : > { %2881 = vmatpush3.bf16.msra.mxu1 %v1438_v6  ;;  %2882 = vmatprep.mubr.msk.bf16.mxu1 %vm3262_vm0, %v3261_v0  ;;  %v782_v11 = vpop.permute.xlu1 %781 }
 0x2bf   : > { %2877 = vmatmul.mubr.msk.bf16.vlgmr.msra.gmra.mxu0 %vm1340_vm3, %v915_v7  ;;  %2892 = vmatprep.subr.bf16.mxu1 %v3261_v0  ;;  %v800_v14 = vcombine.low %v776_v5, %v782_v11  ;;  %v801_v16 = vcombine.high %v776_v5, %v782_v11 }
 0x2c0   : > { %2887 = vmatpush3.bf16.msra.mxu0 %v1484_v9  ;;  %2888 = vmatprep.mubr.msk.bf16.mxu0 %vm3262_vm0, %v3261_v0 }
 0x2c1   : > { %2898 = vmatprep.subr.bf16.mxu0 %v3261_v0  ;;  %v808_v20 = vrot.slane %v800_v14, %v3536_v29  ;;  %v815_v24 = vrot.slane %v801_v16, %v3536_v29 }
 0x2c5   : > { %2883 = vmatmul.mubr.msk.bf16.vlgmr.msra.gmra.mxu1 %vm1340_vm3, %v918_v12 }
 0x2c6   : > { %2894 = vmatprep.mubr.msk.bf16.mxu1 %vm3262_vm0, %v3261_v0 }
 0x2c7   : > { %2889 = vmatmul.mubr.msk.bf16.vlgmr.msra.gmra.mxu0 %vm1340_vm3, %v921_v15  ;;  %v779_v17 = vpop.permute.xlu0 %778 }
 0x2c8   : > { %v784_v18 = vcombine.low %v3579_v49, %v779_v17  ;;  %v785_v19 = vcombine.high %v3579_v49, %v779_v17  ;;  %2900 = vmatprep.mubr.msk.bf16.mxu0 %vm3262_vm0, %v3261_v0 }
 0x2ca   : > { %v792_v22 = vrot.slane %v784_v18, %v3536_v29  ;;  %v799_v23 = vrot.slane %v785_v19, %v3536_v29 }
 0x2cc   : > { %v816_v26 = vcombine.low %v792_v22, %v808_v20  ;;  %v817_v27 = vcombine.high %v792_v22, %v808_v20  ;;  %v832_v31 = vcombine.low %v799_v23, %v815_v24  ;;  %v833_v38 = vcombine.high %v799_v23, %v815_v24 }
 0x2ce   : > { %v824_v28 = vrot.slane %v816_v26, %v3539_v35  ;;  %v831_v30 = vrot.slane %v817_v27, %v3539_v35  ;;  %v840_v37 = vrot.slane %v832_v31, %v3539_v35  ;;  %v847_v42 = vrot.slane %v833_v38, %v3539_v35 }
 0x2d0   : > { %v852_v32 = vpack.c.bf16 %v824_v28, %v824_v28  ;;  %v848_v49 = vcombine.high %v824_v28, %v3261_v0  ;;  %v849_v36 = vcombine.high %v831_v30, %v3261_v0  ;;  %v854_v39 = vpack.c.bf16 %v831_v30, %v831_v30 }
 0x2d1   : > { %v850_v41 = vcombine.high %v840_v37, %v3261_v0  ;;  %v856_v43 = vpack.c.bf16 %v840_v37, %v840_v37  ;;  %v851_v45 = vcombine.high %v847_v42, %v3261_v0  ;;  %v858_v46 = vpack.c.bf16 %v847_v42, %v847_v42 }
 0x2d2   : > { %1631 = vxpose.xlu0.c.b16.start.end [1/1] (short) (narrow) %v852_v32, 16  ;;  %v853_v34 = vpack.c.bf16 %v848_v49, %v848_v49  ;;  %v855_v40 = vpack.c.bf16 %v849_v36, %v849_v36 }
 0x2d3   : > { %v857_v44 = vpack.c.bf16 %v850_v41, %v850_v41  ;;  %v859_v47 = vpack.c.bf16 %v851_v45, %v851_v45 }
 0x2d4   : > { %1647 = vxpose.xlu1.c.b16.start.end [1/1] (short) (narrow) %v853_v34, 16 }
 0x2d6   : > { %1663 = vxpose.xlu0.c.b16.start.end [1/1] (short) (narrow) %v854_v39, 16 }
 0x2d8   : > { %1679 = vxpose.xlu1.c.b16.start.end [1/1] (short) (narrow) %v855_v40, 16 }
 0x2da   : > { %1695 = vxpose.xlu0.c.b16.start.end [1/1] (short) (narrow) %v856_v43, 16 }
 0x2dc   : > { %1711 = vxpose.xlu1.c.b16.start.end [1/1] (short) (narrow) %v857_v44, 16 }
 0x2de   : > { %1727 = vxpose.xlu0.c.b16.start.end [1/1] (short) (narrow) %v858_v46, 16 }
 0x2e0   : > { %1743 = vxpose.xlu1.c.b16.start.end [1/1] (short) (narrow) %v859_v47, 16 }
 0x334   : > { %v1639_v48 = vpop.trf.xlu0 }
 0x336   : > { %v1655_v50 = vpop.trf.xlu1 }
 0x338   : > { %v1671_v51 = vpop.trf.xlu0 }
 0x33a   : > { %v1687_v52 = vpop.trf.xlu1 }
 0x33c   : > { %v1703_v53 = vpop.trf.xlu0 }
 0x33d   : > { %v1759_v54 = vcombine.low %v1639_v48, %v1703_v53 }
 0x33e   : > { %v1719_v55 = vpop.trf.xlu1 }
 0x33f   : > { %v1793_v56 = vcombine.low %v1655_v50, %v1719_v55  ;;  %v1766_v58 = vrot.slane %v1759_v54, %v3536_v29 }
 0x340   : > { %v1735_v57 = vpop.trf.xlu0 }
 0x341   : > { %v1767_v59 = vcombine.low %v1671_v51, %v1735_v57  ;;  %v1800_v62 = vrot.slane %v1793_v56, %v3536_v29 }
 0x342   : > { %v1751_v60 = vpop.trf.xlu1 }
 0x343   : > { %v1774_v63 = vrot.slane %v1767_v59, %v3536_v29  ;;  %v1801_v1 = vcombine.low %v1687_v52, %v1751_v60 }
 0x345   : > { %v1775_v2 = vcombine.low %v1766_v58, %v1774_v63  ;;  %v1776_v3 = vcombine.high %v1766_v58, %v1774_v63  ;;  %v1808_v4 = vrot.slane %v1801_v1, %v3536_v29 }
 0x347   : > { %v1790_v5 = vrot.slane %v1776_v3, %v3539_v35  ;;  %v1809_v6 = vcombine.low %v1800_v62, %v1808_v4  ;;  %v1810_v7 = vcombine.high %v1800_v62, %v1808_v4  ;;  %v1783_v8 = vrot.slane %v1775_v2, %v3539_v35 }
 0x349   : > { %v1824_v9 = vrot.slane %v1810_v7, %v3539_v35  ;;  %v1817_v10 = vrot.slane %v1809_v6, %v3539_v35  ;;  %v1831_v61 = vshrl.u32 %v1783_v8, 16  ;;  %v1791_v11 = vcombine.high %v1783_v8, %v3268_v33 }
 0x34a   : > { %v1847_v12 = vshrl.u32 %v1790_v5, 16  ;;  %v1792_v13 = vcombine.high %v1790_v5, %v3268_v33 }
 0x34b   : > { %v1829_v14 = vpack.i.b16 %v1817_v10, %v1783_v8  ;;  %v1832_v15 = vshrl.u32 %v1817_v10, 16  ;;  %v1825_v16 = vcombine.high %v1817_v10, %v3268_v33  ;;  %v1839_v17 = vshrl.u32 %v1791_v11, 16 }
 0x34c   : > { %v1848_v18 = vshrl.u32 %v1824_v9, 16  ;;  %v1845_v19 = vpack.i.b16 %v1824_v9, %v1790_v5  ;;  %v1826_v20 = vcombine.high %v1824_v9, %v3268_v33  ;;  %v1855_v22 = vshrl.u32 %v1792_v13, 16 }
 0x34d   : > { %1859 = vxpose.xlu0.c.b16.start.end [1/1] (short) (narrow) %v1829_v14, 16  ;;  %v1833_v23 = vpack.i.b16 %v1832_v15, %v1831_v61  ;;  %v1837_v24 = vpack.i.b16 %v1825_v16, %v1791_v11  ;;  %v1840_v26 = vshrl.u32 %v1825_v16, 16 }
 0x34e   : > { %v1849_v27 = vpack.i.b16 %v1848_v18, %v1847_v12  ;;  %v1856_v28 = vshrl.u32 %v1826_v20, 16  ;;  %v1853_v30 = vpack.i.b16 %v1826_v20, %v1792_v13 }
 0x34f   : > { %1875 = vxpose.xlu1.c.b16.start.end [1/1] (short) (narrow) %v1833_v23, 16  ;;  %v1841_v31 = vpack.i.b16 %v1840_v26, %v1839_v17 }
 0x350   : > { %v1857_v32 = vpack.i.b16 %v1856_v28, %v1855_v22 }
 0x351   : > { %1891 = vxpose.xlu0.c.b16.start.end [1/1] (short) (narrow) %v1837_v24, 16 }
 0x353   : > { %1907 = vxpose.xlu1.c.b16.start.end [1/1] (short) (narrow) %v1841_v31, 16 }
 0x37d   : > { %v1382_v49 = vpop.f32.mrf.mxu1 }
 0x37e   : > { %v1526_v34 = vsel %vm1340_vm3, %v1382_v49, -inf }
 0x37f   : > { %v2872_v36 = vpop.f32.mrf.mxu1  ;;  %1527 = vmax.xlane.f32.xlu1 %v1526_v34  ;;  %v1428_v37 = vpop.f32.mrf.mxu0 }
 0x380   : > { %v1529_v38 = vsel %vm1340_vm3, %v1428_v37, -inf }
 0x381   : > { %v1385_v39 = vpop.f32.mrf.mxu1  ;;  %1530 = vmax.xlane.f32.xlu0 %v1529_v38  ;;  %v2878_v40 = vpop.f32.mrf.mxu0 }
 0x383   : > { %v2873_v41 = vpop.f32.mrf.mxu1  ;;  %v1431_v42 = vpop.f32.mrf.mxu0 }
 0x385   : > { %v2879_v43 = vpop.f32.mrf.mxu0  ;;  %v1474_v44 = vpop.f32.mrf.mxu1 }
 0x386   : > { %v1532_v54 = vsel %vm1340_vm3, %v1474_v44, -inf }
 0x387   : > { %v2884_v45 = vpop.f32.mrf.mxu1  ;;  %v1520_v46 = vpop.f32.mrf.mxu0 }
 0x388   : > { %v1535_v53 = vsel %vm1340_vm3, %v1520_v46, -inf }
 0x389   : > { %v1477_v47 = vpop.f32.mrf.mxu1  ;;  %v2890_v48 = vpop.f32.mrf.mxu0 }
 0x38b   : > { %v2885_v50 = vpop.f32.mrf.mxu1  ;;  %v1523_v51 = vpop.f32.mrf.mxu0 }
 0x38d   : > { %v2891_v52 = vpop.f32.mrf.mxu0 }
 0x3ac   : > { %1939 = vxpose.xlu1.c.b16.start.end [1/1] (short) (narrow) %v1849_v27, 16 }
 0x3ae   : > { %1923 = vxpose.xlu0.c.b16.start.end [1/1] (short) (narrow) %v1845_v19, 16 }
 0x3af   : > { %v1867_v56 = vpop.trf.xlu0 }
 0x3b1   : > { %v1883_v55 = vpop.trf.xlu1 }
 0x3b3   : > { %v1899_v58 = vpop.trf.xlu0 }
 0x3b5   : > { %v1915_v57 = vpop.trf.xlu1 }
 0x3b9   : > { %1536 = vmax.xlane.f32.xlu1 %v1535_v53 }
 0x3bb   : > { %1533 = vmax.xlane.f32.xlu0 %v1532_v54 }
 0x3e6   : > { %1971 = vxpose.xlu1.c.b16.start.end [1/1] (short) (narrow) %v1857_v32, 16 }
 0x3e8   : > { %1955 = vxpose.xlu0.c.b16.start.end [1/1] (short) (narrow) %v1853_v30, 16 }
 0x408   : > { %v1528_v59 = vpop.xlane.xlu1 %1527 }
 0x409   : > { %v1538_v60 = vsub.f32 %v1382_v49, %v1528_v59 }
 0x40a   : > { %v1531_v62 = vpop.xlane.xlu0 %1530 }
 0x40b   : > { %v1542_v63 = vmul.f32 1.442695, %v1538_v60  ;;  %v1539_v1 = vsub.f32 %v1428_v37, %v1531_v62 }
 0x40d   : > { %3032 = vpow2.f32 %v1542_v63  ;;  %v1544_v2 = vmul.f32 1.442695, %v1539_v1 }
 0x40e   : > { %v1947_v61 = vpop.trf.xlu1 }
 0x40f   : > { %3034 = vpow2.f32 %v1544_v2  ;;  %v2012_v17 = vcombine.low %v1883_v55, %v1947_v61 }
 0x410   : > { %v1931_v11 = vpop.trf.xlu0 }
 0x411   : > { %v1987_v20 = vcombine.low %v1867_v56, %v1931_v11  ;;  %v2019_v24 = vrot.slane %v2012_v17, %v3536_v29 }
 0x413   : > { %v1994_v28 = vrot.slane %v1987_v20, %v3536_v29 }
 0x41a   : > { %v3033_v3 = vpop.eup %3032 }
 0x41b   : > { %v1550_v4 = vsel %vm1340_vm3, %v3033_v3, 0.0  ;;  %v1627_v5 = vpack.c.bf16 %v3033_v3, %v3033_v3 }
 0x41c   : > { %v3035_v6 = vpop.eup %3034  ;;  %1551 = vadd.xlane.f32.xlu0 %v1550_v4 }
 0x41d   : > { %v2053_v7 = vsel %vm1340_vm3, %v1627_v5, 0  ;;  %v1553_v8 = vsel %vm1340_vm3, %v3035_v6, 0.0  ;;  %v1628_v9 = vpack.c.bf16 %v3035_v6, %v3035_v6 }
 0x41e   : > { %2893 = vmatpush3.bf16.xpose.msra.mxu1 %v2053_v7  ;;  %1554 = vadd.xlane.f32.xlu1 %v1553_v8 }
 0x41f   : > { %v2099_v10 = vsel %vm1340_vm3, %v1628_v9, 0  ;;  %2904 = vmatprep.subr.bf16.mxu1 %v3261_v0 }
 0x420   : > { %2899 = vmatpush3.bf16.xpose.msra.mxu0 %v2099_v10 }
 0x421   : > { %2910 = vmatprep.subr.bf16.mxu0 %v3261_v0 }
 0x442   : > { %v1537_v12 = vpop.xlane.xlu1 %1536 }
 0x443   : > { %v1541_v13 = vsub.f32 %v1520_v46, %v1537_v12 }
 0x444   : > { %v1534_v14 = vpop.xlane.xlu0 %1533 }
 0x445   : > { %v1548_v15 = vmul.f32 1.442695, %v1541_v13  ;;  %v1540_v16 = vsub.f32 %v1474_v44, %v1534_v14 }
 0x447   : > { %3036 = vpow2.f32 %v1548_v15  ;;  %v1546_v18 = vmul.f32 1.442695, %v1540_v16 }
 0x448   : > { %v1979_v19 = vpop.trf.xlu1 }
 0x449   : > { %3038 = vpow2.f32 %v1546_v18  ;;  %v2020_v22 = vcombine.low %v1915_v57, %v1979_v19 }
 0x44a   : > { %v1963_v23 = vpop.trf.xlu0 }
 0x44b   : > { %v2027_v26 = vrot.slane %v2020_v22, %v3536_v29  ;;  %v1995_v27 = vcombine.low %v1899_v58, %v1963_v23  ;;  %v1571_v58 = vand.u32 127, %v617_v21 }
 0x44d   : > { %v2028_v30 = vcombine.low %v2019_v24, %v2027_v26  ;;  %v2002_v31 = vrot.slane %v1995_v27, %v3536_v29  ;;  %v1574_v60 = vsub.s32 %v1571_v58, %v3533_v25  ;;  %v2431_v24 = vsub.s32 0, %v3533_v25 }
 0x44f   : > { %v2035_v32 = vrot.slane %v2028_v30, %v3539_v35  ;;  %v2003_v49 = vcombine.low %v1994_v28, %v2002_v31  ;;  %v2438_v28 = vsub.s32 1, %v3533_v25  ;;  %v2445_v31 = vsub.s32 2, %v3533_v25 }
 0x451   : > { %v2010_v34 = vrot.slane %v2003_v49, %v3539_v35  ;;  %v2041_v36 = vshrl.u32 %v2035_v32, 16  ;;  %v2036_v45 = vcombine.high %v2035_v32, %v3268_v33  ;;  %v2452_v49 = vsub.s32 3, %v3533_v25 }
 0x453   : > { %v2039_v37 = vpack.i.b16 %v2035_v32, %v2010_v34  ;;  %v2040_v38 = vshrl.u32 %v2010_v34, 16  ;;  %v2011_v40 = vcombine.high %v2010_v34, %v3268_v33  ;;  %v2047_v52 = vshrl.u32 %v2036_v45, 16 }
 0x454   : > { %v3037_v39 = vpop.eup %3036 }
 0x455   : > { %2895 = vmatmul.mubr.msk.bf16.vlgmr.msra.gmra.mxu1 %vm1340_vm3, %v2039_v37  ;;  %v1559_v41 = vsel %vm1340_vm3, %v3037_v39, 0.0  ;;  %v2042_v42 = vpack.i.b16 %v2041_v36, %v2040_v38  ;;  %v1630_v43 = vpack.c.bf16 %v3037_v39, %v3037_v39  ;;  %v2046_v50 = vshrl.u32 %v2011_v40, 16 }
 0x456   : > { %v3039_v44 = vpop.eup %3038  ;;  %1560 = vadd.xlane.f32.xlu1 %v1559_v41  ;;  %2906 = vmatprep.mubr.msk.bf16.mxu1 %vm3262_vm0, %v3261_v0  ;;  %v2045_v53 = vpack.i.b16 %v2036_v45, %v2011_v40  ;;  %v2459_v36 = vsub.s32 4, %v3533_v25  ;;  %v2466_v38 = vsub.s32 5, %v3533_v25  ;;  %v2473_v40 = vsub.s32 6, %v3533_v25 }
 0x457   : > { %2901 = vmatmul.mubr.msk.bf16.vlgmr.msra.gmra.mxu0 %vm1340_vm3, %v2042_v42  ;;  %v1556_v46 = vsel %vm1340_vm3, %v3039_v44, 0.0  ;;  %v2191_v47 = vsel %vm1340_vm3, %v1630_v43, 0  ;;  %v1629_v48 = vpack.c.bf16 %v3039_v44, %v3039_v44  ;;  %v2048_v33 = vpack.i.b16 %v2047_v52, %v2046_v50 }
 0x458   : > { %1557 = vadd.xlane.f32.xlu0 %v1556_v46  ;;  %2911 = vmatpush3.bf16.xpose.msra.mxu0 %v2191_v47  ;;  %v2480_v42 = vsub.s32 7, %v3533_v25 }
 0x459   : > { %v2145_v51 = vsel %vm1340_vm3, %v1629_v48, 0  ;;  %2912 = vmatprep.mubr.msk.bf16.mxu0 %vm3262_vm0, %v3261_v0 }
 0x45a   : > { %2905 = vmatpush3.bf16.xpose.msra.mxu1 %v2145_v51 }
 0x45b   : > { %2916 = vmatprep.subr.bf16.mxu1 %v3261_v0 }
 0x45f   : > { %2913 = vmatmul.mubr.msk.bf16.vlgmr.msra.gmra.mxu0 %vm1340_vm3, %v2048_v33 }
 0x461   : > { %2907 = vmatmul.mubr.msk.bf16.vlgmr.msra.gmra.mxu1 %vm1340_vm3, %v2045_v53 }
 0x462   : > { %2920 = vmatprep.mubr.msk.bf16.mxu1 %vm3262_vm0, %v3261_v0 }
 0x4a5   : > { %v1552_v55 = vpop.xlane.xlu0 %1551 }
 0x4a7   : > { %v1555_v54 = vpop.xlane.xlu1 %1554 }
 0x4a8   : > { %3040 = vrcp.f32 %v1555_v54 }
 0x4a9   : > { %3042 = vrcp.f32 %v1552_v55 }
 0x4b5   : > { %v3041_v59 = vpop.eup %3040 }
 0x4b6   : > { %v3043_v62 = vpop.eup %3042  ;;  %v1579_v63 = vrot.slane %v3041_v59, %v1574_v60 }
 0x4b7   : > { %v1575_v3 = vrot.slane %v3043_v62, %v1574_v60 }
 0x4b9   : > { %v1589_v6 = vsel %vm1588_vm4, %v1579_v63, %v1575_v3 }
 0x4df   : > { %v1561_v56 = vpop.xlane.xlu1 %1560 }
 0x4e0   : > { %3044 = vrcp.f32 %v1561_v56 }
 0x4e1   : > { %v1558_v57 = vpop.xlane.xlu0 %1557 }
 0x4e2   : > { %3046 = vrcp.f32 %v1558_v57 }
 0x4ed   : > { %v3045_v1 = vpop.eup %3044 }
 0x4ee   : > { %v1587_v5 = vrot.slane %v3045_v1, %v1574_v60 }
 0x4ef   : > { %v3047_v2 = vpop.eup %3046 }
 0x4f0   : > { %v1583_v4 = vrot.slane %v3047_v2, %v1574_v60 }
 0x4f2   : > { %v1591_v7 = vsel %vm1590_vm5, %v1583_v4, %v1589_v6 }
 0x4f3   : > { %v1593_v8 = vsel %vm1592_vm6, %v1587_v5, %v1591_v7 }
 0x4f4   : > { %1595 = vxpose.xlu0.b32.start.end [1/1] (short) (narrow) %v1593_v8, 8 }
 0x515   : > { %v2089_v9 = vpop.f32.mrf.mxu1 }
 0x516   : > { %2233 = vxpose.xlu0.b32.start.end [1/1] (short) (narrow) %v2089_v9, 8 }
 0x517   : > { %v2896_v21 = vpop.f32.mrf.mxu1  ;;  %v2135_v10 = vpop.f32.mrf.mxu0 }
 0x519   : > { %v2092_v61 = vpop.f32.mrf.mxu1  ;;  %v2902_v11 = vpop.f32.mrf.mxu0 }
 0x51a   : > { %v3030_v11 = vld [vmem:[#allocation10 + $0x8] sm:$0xff]  }
 0x51b   : > { %v2897_v12 = vpop.f32.mrf.mxu1  ;;  %v2138_v13 = vpop.f32.mrf.mxu0  ;;  %2917 = vmatpush3.bf16.msra.mxu1 %v3030_v11 }
 0x51c   : > { %2918 = vmatprep.subr.bf16.mxu1 %v3261_v0 }
 0x51d   : > { %v2903_v14 = vpop.f32.mrf.mxu0 }
 0x51f   : > { %v2227_v15 = vpop.f32.mrf.mxu0 }
 0x521   : > { %v2181_v16 = vpop.f32.mrf.mxu1  ;;  %v2914_v17 = vpop.f32.mrf.mxu0 }
 0x522   : > { %2297 = vxpose.xlu0.b32.start.end [1/1] (short) (narrow) %v2181_v16, 8 }
 0x523   : > { %v2908_v18 = vpop.f32.mrf.mxu1  ;;  %v2230_v19 = vpop.f32.mrf.mxu0 }
 0x525   : > { %v2184_v20 = vpop.f32.mrf.mxu1  ;;  %v2915_v22 = vpop.f32.mrf.mxu0 }
 0x526   : > { %2329 = vxpose.xlu0.b32.start.end [1/1] (short) (narrow) %v2227_v15, 8 }
 0x527   : > { %v2909_v23 = vpop.f32.mrf.mxu1 }
 0x570   : > { %v1611_v26 = vpop.trf.xlu0 }
 0x571   : > { %v2432_v27 = vrot.slane %v1611_v26, %v2431_v24  ;;  %v2439_v30 = vrot.slane %v1611_v26, %v2438_v28  ;;  %v2446_v32 = vrot.slane %v1611_v26, %v2445_v31  ;;  %v2453_v34 = vrot.slane %v1611_v26, %v2452_v49 }
 0x572   : > { %v2460_v37 = vrot.slane %v1611_v26, %v2459_v36  ;;  %v2467_v39 = vrot.slane %v1611_v26, %v2466_v38  ;;  %v2474_v41 = vrot.slane %v1611_v26, %v2473_v40  ;;  %v2481_v43 = vrot.slane %v1611_v26, %v2480_v42  ;;  %v3031_v26 = vld [vmem:[#allocation10] sm:$0xff]  }
 0x573   : > { %2434 = vbcast.lane.b32.xlu1 %v2432_v27, 256  ;;  %2919 = vmatpush3.bf16.msra.mxu1 %v3031_v26 }
 0x577   : > { %2441 = vbcast.lane.b32.xlu1 %v2439_v30, 256 }
 0x57b   : > { %2448 = vbcast.lane.b32.xlu1 %v2446_v32, 256 }
 0x57f   : > { %2455 = vbcast.lane.b32.xlu1 %v2453_v34, 256 }
 0x583   : > { %2462 = vbcast.lane.b32.xlu1 %v2460_v37, 256 }
 0x587   : > { %2469 = vbcast.lane.b32.xlu1 %v2467_v39, 256 }
 0x58b   : > { %2476 = vbcast.lane.b32.xlu1 %v2474_v41, 256 }
 0x58f   : > { %2483 = vbcast.lane.b32.xlu1 %v2481_v43, 256 }
 0x592   : > { %v2249_v51 = vpop.trf.xlu0 }
 0x59e   : > { %v2313_v33 = vpop.trf.xlu0 }
 0x59f   : > { %v2361_v55 = vcombine.low %v2249_v51, %v2313_v33  ;;  %v2362_v56 = vcombine.high %v2249_v51, %v2313_v33 }
 0x5a1   : > { %v2369_v59 = vrot.slane %v2361_v55, %v3536_v29  ;;  %v2376_v60 = vrot.slane %v2362_v56, %v3536_v29 }
 0x5a2   : > { %v2345_v54 = vpop.trf.xlu0 }
 0x5b8   : > { %2265 = vxpose.xlu1.b32.start.end [1/1] (short) (narrow) %v2135_v10, 8 }
 0x5e5   : > { %v2435_v44 = vpop.permute.xlu1 %2434 }
 0x5e9   : > { %v2442_v45 = vpop.permute.xlu1 %2441 }
 0x5ed   : > { %v2449_v46 = vpop.permute.xlu1 %2448 }
 0x5f1   : > { %v2456_v47 = vpop.permute.xlu1 %2455 }
 0x5f5   : > { %v2463_v48 = vpop.permute.xlu1 %2462 }
 0x5f9   : > { %v2470_v50 = vpop.permute.xlu1 %2469 }
 0x5fd   : > { %v2477_v52 = vpop.permute.xlu1 %2476 }
 0x601   : > { %v2484_v53 = vpop.permute.xlu1 %2483 }
 0x634   : > { %v2281_v57 = vpop.trf.xlu1 }
 0x635   : > { %v2377_v58 = vcombine.low %v2281_v57, %v2345_v54  ;;  %v2378_v25 = vcombine.high %v2281_v57, %v2345_v54 }
 0x637   : > { %v2385_v62 = vrot.slane %v2377_v58, %v3536_v29  ;;  %v2392_v63 = vrot.slane %v2378_v25, %v3536_v29 }
 0x639   : > { %v2393_v1 = vcombine.low %v2369_v59, %v2385_v62  ;;  %v2394_v2 = vcombine.high %v2369_v59, %v2385_v62  ;;  %v2409_v3 = vcombine.low %v2376_v60, %v2392_v63  ;;  %v2410_v4 = vcombine.high %v2376_v60, %v2392_v63 }
 0x63b   : > { %v2401_v5 = vrot.slane %v2393_v1, %v3539_v35  ;;  %v2408_v6 = vrot.slane %v2394_v2, %v3539_v35  ;;  %v2417_v7 = vrot.slane %v2409_v3, %v3539_v35  ;;  %v2424_v8 = vrot.slane %v2410_v4, %v3539_v35 }
 0x63d   : > { %v2425_v9 = vcombine.high %v2401_v5, %v3261_v0  ;;  %v2426_v21 = vcombine.high %v2408_v6, %v3261_v0  ;;  %v2427_v10 = vcombine.high %v2417_v7, %v3261_v0  ;;  %v2428_v61 = vcombine.high %v2424_v8, %v3261_v0 }
 0x63e   : > { %v2485_v12 = vmul.f32 %v2435_v44, %v2401_v5  ;;  %v2487_v13 = vmul.f32 %v2449_v46, %v2408_v6  ;;  %v2489_v14 = vmul.f32 %v2463_v48, %v2417_v7  ;;  %v2491_v15 = vmul.f32 %v2477_v52, %v2424_v8 }
 0x63f   : > { %v2486_v16 = vmul.f32 %v2442_v45, %v2425_v9  ;;  %v2488_v17 = vmul.f32 %v2456_v47, %v2426_v21  ;;  %v2490_v18 = vmul.f32 %v2470_v50, %v2427_v10  ;;  %v2492_v19 = vmul.f32 %v2484_v53, %v2428_v61  ;;  %v2808_v50 = vld [vmem:[%s3790_s8] ss:$0 sm:$0xff] }
 0x640   : > { %v2493_v20 = vcombine.low %v2485_v12, %v2487_v13  ;;  %v2509_v22 = vcombine.low %v2489_v14, %v2491_v15 }
 0x641   : > { %v2501_v23 = vcombine.low %v2486_v16, %v2488_v17  ;;  %v2517_v24 = vcombine.low %v2490_v18, %v2492_v19 }
 0x642   : > { %v2500_v27 = vrot.slane %v2493_v20, %v3536_v29  ;;  %v2516_v30 = vrot.slane %v2509_v22, %v3536_v29 }
 0x643   : > { %v2508_v28 = vrot.slane %v2501_v23, %v3536_v29  ;;  %v2524_v31 = vrot.slane %v2517_v24, %v3536_v29 }
 0x645   : > { %v2526_v32 = vcombine.high %v2500_v27, %v2508_v28  ;;  %v2542_v49 = vcombine.high %v2516_v30, %v2524_v31  ;;  %v2525_v34 = vcombine.low %v2500_v27, %v2508_v28  ;;  %v2541_v36 = vcombine.low %v2516_v30, %v2524_v31 }
 0x647   : > { %v2540_v37 = vrot.slane %v2526_v32, %v3539_v35  ;;  %v2556_v0 = vrot.slane %v2542_v49, %v3539_v35  ;;  %v2533_v38 = vrot.slane %v2525_v34, %v3539_v35  ;;  %v2549_v39 = vrot.slane %v2541_v36, %v3539_v35 }
 0x649   : > { %v2559_v40 = vcombine.low %v2540_v37, %v2556_v0  ;;  %v2558_v41 = vcombine.high %v2533_v38, %v2549_v39  ;;  %v2557_v42 = vcombine.low %v2533_v38, %v2549_v39  ;;  %v2560_v29 = vcombine.high %v2540_v37, %v2556_v0 }
 0x64b   : > { %2566 = vrot.lane.b32.xlu1 %v2559_v40, %s3269_s19  ;;  %2562 = vrot.lane.b32.xlu0 %v2558_v41, %s3270_s13 }
 0x64f   : > { %2570 = vrot.lane.b32.xlu0 %v2560_v29, %s3271_s24 }
 0x6bd   : > { %v2563_v43 = vpop.permute.xlu0 %2562  ;;  %v2567_v44 = vpop.permute.xlu1 %2566 }
 0x6be   : > { %v2573_v45 = vsel %vm1340_vm3, %v2557_v42, %v2563_v43 }
 0x6bf   : > { %v2575_v35 = vsel %vm2574_vm7, %v2573_v45, %v2567_v44 }
 0x6c1   : > { %v2571_v46 = vpop.permute.xlu0 %2570 }
 0x6c2   : > { %v2577_v47 = vsel %vm2576_vm8, %v2575_v35, %v2571_v46 }
 0x6c3   : > { %v2578_v48 = vpack.c.bf16 %v2577_v47, %v2577_v47 }
 0x6c5   : > { %2921 = vmatmul.mubr.msk.bf16.vlgmr.msra.gmra.mxu1 %vm432_vm1, %v2578_v48 }
 0x785   : > { %v2639_v51 = vpop.f32.mrf.mxu1 }
 0x786   : > { %v2640_v52 = vadd.f32 %v2808_v50, %v2639_v51 }
 0x787   : > { %v2922_v33 = vpop.f32.mrf.mxu1 }
 0x788   : > { %2645 = vst.msk [vmem:[%s405_s16] sm:$0xff] %vm432_vm1, %v2640_v52 }
 0x789   : > { %v2642_v53 = vpop.f32.mrf.mxu1 }
 0x78a   : > { %3193 = shalt.err (!%p3190_p11)
}
 0x78b   : > { %s3194_s19 = scalar_lea.hbm %s3738_s28, 128  ;;  %s3198_s24 = scalar_lea.hbm %s3791_s9, 256 }
 0x78c   : > { %p3195_p13 = scmp.ne.s32.totalorder %s3738_s28, %s3194_s19  ;;  %p3199_p4 = scmp.lt.s32.totalorder %s3738_s28, %s3791_s9 }
 0x78d   : > { %p3200_p6 = scmp.lt.s32.totalorder %s3198_s24, %s3194_s19 }
 0x78e   : > { %p3196_p1 = pnand %p3195_p13, %p3817_p7 }
 0x78f   : > { %p3201_p5 = por %p3200_p6, %p3199_p4 }
 0x790   : > { %p3197_p3 = pneg %p3196_p1 }
 0x792   : > { %p3202_p8 = pnand %p3201_p5, %p3197_p3 }
 0x794   : > { %3205 = shalt.err (!%p3202_p8)
}
 0x795   : > { %2942 = dma.vmem_to_hbm [thread:$0]  (%p3817_p7), %s3740_s23, 128, %s3738_s28, %s2647_s15   ;;  %v2923_v54 = vpop.f32.mrf.mxu1 }
 0x796 PF: > { %s2672_s1 = sand.u32 1, %s3240_s30   ;;  %p3818_p10 = scmp.ne.s32.totalorder %s3809_s17, 0 }
 0x797   : > { %p3819_p0 = scmp.ge.s32.totalorder %s3252_s12, 2  ;;  %s2673_s16 = scalar_lea.sflag [#allocation4], %s2672_s1 }
 0x799   : > { %p2962_p12 = pnand %p3819_p0, %p3818_p10 }
 0x79b   : > { %p2963_p2 = pneg %p2962_p12 }
 0x79d   : > { %3235 = dma.done.wait (%p2963_p2), %s2673_s16, 128  }
 0x79e   : > { %3237 = vsyncadd (%p2963_p2), %s2673_s16, 4294967168  ;;  %p24_p9 = scmp.ge.s32.totalorder %s3424_s26, 4   ;;  %s3820_s30 = smov %s3244_s10 }
 0x79f   : > { %s3821_s10 = smov %s3248_s11  ;;  %s3822_s11 = smov %s3435_s29 }
 0x7a0   : > { %s3823_s12 = smov %s3424_s26  ;;  %26 = sbr.rel (!%p24_p9) target bundleno = 12 (0xc), region = 117 }
 0x7a5   :  { %2678 = vsyncpa [#allocation3], 1 }
 0x7a6   :  { %2680 = vsyncpa [#allocation3 + $0x1], 1 }
 0x7a7   :  { %2681 = vsyncpa [#allocation6], 1 }
 0x7a8   :  { %2682 = vsyncpa [#allocation9], 1 }
 0x7a9   :  { %2683 = vsyncpa [#allocation4], 1 }
 0x7aa   :  { %2685 = vsyncpa [#allocation4 + $0x1], 1 }

</bundles_post_ra>
